<compile_context>
chip_gen: v7x
topology: tpu7x:2x2x1
jax: 0.10.0
libtpu: 0.0.40
codegen_flags: <defaults>
</compile_context>

<pallas_src>
import jax
import jax.numpy as jnp
from jax.experimental import pallas as pl
from jax.experimental.pallas import tpu as pltpu

_LANE = 128


def _reparam_kernel(means_ref, std_ref, eps_ref, z_ref):
    # means_ref / std_ref: (1, Dp) broadcast over the sample/row axis.
    # eps_ref / z_ref:     (block_n, Dp)
    z_ref[...] = means_ref[...] + std_ref[...] * eps_ref[...]


def _pallas_reparam(means_row, std_row, eps2d, *, block_n):
    """means_row/std_row: (1, Dp); eps2d: (rows, Dp), Dp % 128 == 0."""
    rows, dp = eps2d.shape

    if rows <= block_n:
        # Single full-extent block (exempt from the (8,128) divisibility rule).
        bn = rows
        rows_pad = rows
    else:
        bn = max(8, (block_n // 8) * 8)          # keep sublane-aligned
        rows_pad = pl.cdiv(rows, bn) * bn
        if rows_pad != rows:
            eps2d = jnp.pad(eps2d, ((0, rows_pad - rows), (0, 0)))

    grid = (rows_pad // bn,)
    out = pl.pallas_call(
        _reparam_kernel,
        out_shape=jax.ShapeDtypeStruct((rows_pad, dp), eps2d.dtype),
        grid=grid,
        in_specs=[
            pl.BlockSpec((1, dp), lambda i: (0, 0)),     # means (resident)
            pl.BlockSpec((1, dp), lambda i: (0, 0)),     # std   (resident)
            pl.BlockSpec((bn, dp), lambda i: (i, 0)),    # epsilon tile
        ],
        out_specs=pl.BlockSpec((bn, dp), lambda i: (i, 0)),
        compiler_params=pltpu.CompilerParams(
            dimension_semantics=("parallel",)),          # shard across TCs on v7x
    )(means_row, std_row, eps2d)

    if rows_pad != rows:
        out = out[:rows]
    return out


def variational_sample(means, log_std, epsilon, *, block_n=1024,
                       min_pallas_elems=1 << 20, force_pallas=True):
    """means, log_std: (D,); epsilon: (N, D) -> z: (N, D) = means + exp(log_std)*eps."""
    n, d = epsilon.shape
    # Hoist the exp out of the kernel: it is only D elements.
    std = jnp.exp(log_std)

    if (not force_pallas) and (n * d) < min_pallas_elems:
        # Tiny problem: fused XLA elementwise is strictly faster than a kernel launch.
        return means + std * epsilon

    dtype = epsilon.dtype
    means = means.astype(dtype)
    std = std.astype(dtype)

    if d % _LANE == 0:
        # Already lane-dense.
        out = _pallas_reparam(means.reshape(1, d), std.reshape(1, d),
                              epsilon, block_n=block_n)
        return out
    elif (_LANE % d == 0) and ((n * d) % _LANE == 0):
        # Flatten (N, D) -> (N*D//128, 128); tile params to a 128-wide row.
        reps = _LANE // d
        means_row = jnp.tile(means, reps).reshape(1, _LANE)
        std_row = jnp.tile(std, reps).reshape(1, _LANE)
        eps2d = epsilon.reshape((n * d) // _LANE, _LANE)
        out = _pallas_reparam(means_row, std_row, eps2d, block_n=block_n)
        return out.reshape(n, d)
    else:
        # General fallback: pad D up to a multiple of 128 (pad lanes are benign).
        dp = pl.cdiv(d, _LANE) * _LANE
        means_row = jnp.pad(means, (0, dp - d)).reshape(1, dp)
        std_row = jnp.pad(std, (0, dp - d)).reshape(1, dp)
        eps2d = jnp.pad(epsilon, ((0, 0), (0, dp - d)))
        out = _pallas_reparam(means_row, std_row, eps2d, block_n=block_n)
        return out[:, :d]


if __name__ == "__main__":
    # Module config: tot_latent_dim * n_zs = D
    tot_latent_dim = 16
    n_zs = 2
    D = tot_latent_dim * n_zs          # 32
    num_samps = 8

    # Deterministic parameter init matching the PyTorch __init__:
    #   means   = zeros(D)
    #   log_std = -1 * ones(D)
    means = jnp.zeros((D,), dtype=jnp.float32)
    log_std = -jnp.ones((D,), dtype=jnp.float32)

    key = jax.random.PRNGKey(0)
    k_small, k_big = jax.random.split(key)

    # 1) Small shape matching the module's typical call (forces the Pallas path).
    epsilon = jax.random.normal(k_small, (num_samps, D), dtype=jnp.float32)
    z = jax.block_until_ready(variational_sample(means, log_std, epsilon))
    z_ref = means + jnp.exp(log_std) * epsilon
    assert z.shape == (num_samps, D)
    assert jnp.allclose(z, z_ref, atol=1e-6, rtol=1e-6)

    # 2) Larger sample count to exercise the tiled / pipelined grid (>1 block).
    big_n = 4096
    eps_big = jax.random.normal(k_big, (big_n, D), dtype=jnp.float32)
    z_big = jax.block_until_ready(
        variational_sample(means, log_std, eps_big, block_n=256))
    z_big_ref = means + jnp.exp(log_std) * eps_big
    assert z_big.shape == (big_n, D)
    assert jnp.allclose(z_big, z_big_ref, atol=1e-6, rtol=1e-6)

    print("KERNEL_OK")
</pallas_src>

<mosaic_0001>
module attributes {stable_mosaic.version = 11 : i64} {
  func.func @_reparam_kernel(%arg0: i32, %arg1: memref<1x128xf32, #tpu.memory_space<vmem>>, %arg2: memref<1x128xf32, #tpu.memory_space<vmem>>, %arg3: memref<2x128xf32, #tpu.memory_space<vmem>>, %arg4: memref<2x128xf32, #tpu.memory_space<vmem>>) attributes {dimension_semantics = [#tpu.dimension_semantics<parallel>], iteration_bounds = array<i64: 1>, scalar_prefetch = 0 : i64, scratch_operands = 0 : i64, tpu.core_type = #tpu.core_type<tc>, window_params = [{pipeline_mode = #tpu.pipeline_mode<synchronous>, transform_indices = @transform_0, window_bounds = array<i64: 1, 128>}, {pipeline_mode = #tpu.pipeline_mode<synchronous>, transform_indices = @transform_1, window_bounds = array<i64: 1, 128>}, {transform_indices = @transform_2, window_bounds = array<i64: 2, 128>}, {transform_indices = @transform_3, window_bounds = array<i64: 2, 128>}]} {
    %c0 = arith.constant 0 : index
    %c0_0 = arith.constant 0 : index
    %0 = vector.load %arg1[%c0, %c0_0] : memref<1x128xf32, #tpu.memory_space<vmem>>, vector<1x128xf32>
    %c0_1 = arith.constant 0 : index
    %c0_2 = arith.constant 0 : index
    %1 = vector.load %arg2[%c0_1, %c0_2] : memref<1x128xf32, #tpu.memory_space<vmem>>, vector<1x128xf32>
    %c0_3 = arith.constant 0 : index
    %c0_4 = arith.constant 0 : index
    %2 = vector.load %arg3[%c0_3, %c0_4] : memref<2x128xf32, #tpu.memory_space<vmem>>, vector<2x128xf32>
    %3 = vector.broadcast %1 : vector<1x128xf32> to vector<2x128xf32>
    %4 = arith.mulf %3, %2 : vector<2x128xf32>
    %5 = vector.broadcast %0 : vector<1x128xf32> to vector<2x128xf32>
    %6 = arith.addf %5, %4 : vector<2x128xf32>
    %c0_5 = arith.constant 0 : index
    %c0_6 = arith.constant 0 : index
    %7 = vector.load %arg4[%c0_5, %c0_6] : memref<2x128xf32, #tpu.memory_space<vmem>>, vector<2x128xf32>
    tpu.vector_store %arg4[%c0_5, %c0_6], %6 {strides = array<i32>} : memref<2x128xf32, #tpu.memory_space<vmem>>, vector<2x128xf32>,
    return
  }
  func.func @transform_0(%arg0: i32) -> (i32, i32) {
    %c0_i32 = arith.constant 0 : i32
    %c0_i32_0 = arith.constant 0 : i32
    %c0_i32_1 = arith.constant 0 : i32
    return %c0_i32, %c0_i32_0 : i32, i32
  }
  func.func @transform_1(%arg0: i32) -> (i32, i32) {
    %c0_i32 = arith.constant 0 : i32
    %c0_i32_0 = arith.constant 0 : i32
    %c0_i32_1 = arith.constant 0 : i32
    return %c0_i32, %c0_i32_0 : i32, i32
  }
  func.func @transform_2(%arg0: i32) -> (i32, i32) {
    %c0_i32 = arith.constant 0 : i32
    %c0_i32_0 = arith.constant 0 : i32
    return %arg0, %c0_i32 : i32, i32
  }
  func.func @transform_3(%arg0: i32) -> (i32, i32) {
    %c0_i32 = arith.constant 0 : i32
    %c0_i32_0 = arith.constant 0 : i32
    return %arg0, %c0_i32 : i32, i32
  }
}

</mosaic_0001>

<bundles_post_ra>
// kernel: tpu_custom_call.1
= control target key start
LH: loop header
LB: loop body
LE: loop exit
PB: predicated region body
PF: predicated region fallthrough
CT: control target
= control target key end

     0   :  { %8 = vsyncpa [#allocation3], 0  ;;  %s164_s0 = inlined_call_operand.hbm [shape: f32[1,128], index: 0, kind: input, shape index: {}]   ;;  %s165_s1 = inlined_call_operand.vmem [shape: f32[1,128], index: 1, kind: input, shape index: {}]   ;;  %s166_s2 = inlined_call_operand.vmem [shape: f32[2,128], index: 2, kind: input, shape index: {}]   ;;  %s167_s3 = inlined_call_operand.hbm [shape: f32[2,128], index: 3, kind: output, shape index: {}]  }
   0x1   :  { %9 = vsyncpa [#allocation4], 0  ;;  %s112_s12 = smov [#allocation2]   ;;  %s64_s16 = scalar_lea.hbm %s164_s0, 16 }
   0x2   :  { %s16_s13 = sshll.u32 %s112_s12, 4  ;;  %p65_p0 = scmp.ne.s32.totalorder %s164_s0, %s64_s16  ;;  %s17_s13 = int_to_ptr.vmem [resolvable:$true] %s16_s13 }
   0x3   :  { %p68_p1 = scmp.lt.u32.totalorder %s64_s16, %s164_s0 }
   0x5   :  { %p70_p2 = pnand %p68_p1, %p65_p0 }
   0x7   :  { %73 = shalt.err (!%p70_p2)
}
   0x8   :  { %s74_s21 = scalar_lea.vmem %s17_s13, 16  ;;  %s78_s22 = scalar_lea.vmem %s17_s13, 32 }
   0x9   :  { %p75_p3 = scmp.ne.s32.totalorder %s17_s13, %s74_s21  ;;  %p79_p4 = scmp.lt.s32.totalorder %s17_s13, %s17_s13 }
   0xa   :  { %p80_p5 = scmp.lt.s32.totalorder %s78_s22, %s74_s21 }
   0xc   :  { %p81_p6 = por %p80_p5, %p79_p4 }
   0xe   :  { %p82_p7 = pnand %p81_p6, %p75_p3 }
  0x10   :  { %85 = shalt.err (!%p82_p7)
}
  0x11   :  { %19 = dma.hbm_to_vmem [thread:$0]  %s164_s0, 16, %s17_s13, [#allocation3]  }
  0x12   :  { %108 = dma.done.wait [#allocation3], 16  }
  0x13   :  { %109 = vsyncadd [#allocation3], 4294967280  ;;  %s113_s25 = smov [#allocation5]   ;;  %v61_v0 = vld [vmem:[#allocation2] ss:$0 sm:$0xff] }
  0x14   :  { %s51_s26 = sshll.u32 %s113_s25, 4  ;;  %v60_v1 = vld [vmem:[%s165_s1] ss:$0 sm:$0xff]  ;;  %s52_s26 = int_to_ptr.vmem [resolvable:$true] %s51_s26 }
  0x15   :  { %v29_v2 = vld [vmem:[%s166_s2] sm:$0x3]  ;;  %s86_s4 = scalar_lea.vmem %s52_s26, 32  ;;  %p91_p9 = scmp.lt.s32.totalorder %s52_s26, %s52_s26 }
  0x16   :  { %v36_v3 = vmul.f32 %v60_v1, %v29_v2  ;;  %p87_p8 = scmp.ne.s32.totalorder %s52_s26, %s86_s4  ;;  %p92_p10 = scmp.lt.s32.totalorder %s86_s4, %s86_s4 }
  0x18   :  { %v43_v4 = vadd.f32 %v61_v0, %v36_v3  ;;  %p93_p11 = por %p92_p10, %p91_p9 }
  0x1a   :  { %44 = vst [vmem:[#allocation5] sm:$0x3] %v43_v4  ;;  %p94_p12 = pnand %p93_p11, %p87_p8 }
  0x1c   :  { %97 = shalt.err (!%p94_p12)
}
  0x1d   :  { %s98_s6 = scalar_lea.hbm %s167_s3, 32 }
  0x1e   :  { %p99_p13 = scmp.ne.s32.totalorder %s167_s3, %s98_s6  ;;  %p102_p0 = scmp.lt.u32.totalorder %s98_s6, %s167_s3 }
  0x20   :  { %p104_p1 = pnand %p102_p0, %p99_p13 }
  0x22   :  { %107 = shalt.err (!%p104_p1)
}
  0x23   :  { %54 = dma.vmem_to_hbm [thread:$0]  %s52_s26, 32, %s167_s3, [#allocation4]  }
  0x24   :  { %110 = dma.done.wait [#allocation4], 32  }
  0x25   :  { %111 = vsyncadd [#allocation4], 4294967264 }
  0x26   :  { %58 = vsyncpa [#allocation3], 1 }
  0x27   :  { %59 = vsyncpa [#allocation4], 1 }

</bundles_post_ra>
